<compile_context>
chip_gen: v5e
topology: v5e:2x2
jax: 0.10.0
libtpu: 0.0.40
codegen_flags: <defaults>
</compile_context>

<pallas_src>
import functools

import jax
import jax.numpy as jnp
from jax.experimental import pallas as pl
from jax.experimental.pallas import tpu as pltpu

_LANE = 128
_SUBLANE = 8


def _round_up(x, m):
    return (x + m - 1) // m * m


# --------------------------------------------------------------------------- #
# Wrapper-side layout planning (reshapes / tiny-parameter pads only; the big
# image / text operands are never concatenated or copied).
# --------------------------------------------------------------------------- #
def _plan_text_layout(text):
    """Lane-dense view of text.
    Returns (text_v, rows, lanes, reps, gate_w, c_pad, s_pad)."""
    B, S, C = text.shape
    if C <= _LANE and _LANE % C == 0:
        group = _LANE // C                       # text rows folded per 128-lane row
        s_pad = _round_up(S, group) - S          # at most group-1 extra rows
        if s_pad:
            text = jnp.pad(text, ((0, 0), (0, s_pad), (0, 0)))
        rows = (S + s_pad) * C // _LANE
        return text.reshape(B, rows, _LANE), rows, _LANE, group, C, 0, s_pad
    if C % _LANE == 0:                           # channels-last already lane-dense
        return text, S, C, 1, C, 0, 0
    # Awkward C (e.g. 96, 160): pad channels to a multiple of 128 so every store
    # is a full-lane unmasked vst; output is sliced back in the wrapper.
    c_pad = _round_up(C, _LANE) - C
    text = jnp.pad(text, ((0, 0), (0, 0), (0, c_pad)))
    return text, S, C + c_pad, 1, C + c_pad, c_pad, 0


def _plan_image_layout(image_re, image_im, select_para):
    """Lane-dense view of the gate operands (pure reshape when it applies).
    Returns (img_re_v, img_im_v, para_re_v, para_nim_v, rows, lanes, reps)."""
    B, N, C = image_re.shape
    para_re = select_para[..., 0].astype(jnp.float32)
    para_nim = (-select_para[..., 1]).astype(jnp.float32)   # pre-negate imag part
    if C <= _LANE and _LANE % C == 0 and (N * C) % _LANE == 0:
        rows = (N * C) // _LANE
        return (image_re.reshape(B, rows, _LANE),
                image_im.reshape(B, rows, _LANE),
                para_re.reshape(rows, _LANE),
                para_nim.reshape(rows, _LANE),
                rows, _LANE, _LANE // C)
    return image_re, image_im, para_re, para_nim, N, C, 1


def _prep_weights(conv_w, conv_b, C, gate_w, img_reps):
    """Conv1d(k=1) as a (img_lanes, gate_w) matmul operand + (1, gate_w) bias."""
    wt = conv_w[:, :, 0].T.astype(jnp.float32)               # (C_in, C_out)
    bias = conv_b.reshape(1, C).astype(jnp.float32)
    if gate_w != C:                                          # padded-channel path
        wt = jnp.pad(wt, ((0, 0), (0, gate_w - C)))
        bias = jnp.pad(bias, ((0, 0), (0, gate_w - C)))
    if img_reps > 1:
        # Lane-dense image view: a summed 128-lane row holds img_reps groups of
        # C channels; vertically tiling W folds those groups inside the matmul.
        wt = jnp.tile(wt, (img_reps, 1))                     # (img_lanes, gate_w)
    return wt, bias


def _pick_tile_rows(total_rows, row_bytes, *, target_bytes, override=None,
                    ensure_two_tiles=False):
    if override is not None:
        t = min(int(override), total_rows)
    else:
        t = max(_SUBLANE, (target_bytes // max(row_bytes, 1)) // _SUBLANE * _SUBLANE)
        if ensure_two_tiles and total_rows > _SUBLANE:
            # B == 1: keep >= 2 row tiles so a core-parallel split gives both
            # v7x TensorCores work on this mem-bound broadcast.
            t = min(t, _round_up((total_rows + 1) // 2, _SUBLANE))
    if t >= total_rows:
        return total_rows
    return max(_SUBLANE, t // _SUBLANE * _SUBLANE)


# --------------------------------------------------------------------------- #
# Kernel bodies
# --------------------------------------------------------------------------- #
def _fused_kernel(img_re_ref, img_im_ref, para_re_ref, para_nim_ref,
                  wt_ref, bias_ref, text_ref, out_ref, gate_ref,
                  *, inv_n, txt_reps):
    """grid = (B, text-row tiles).  Gate operands' block index is constant over
    the tile axis (VMEM-resident); gate computed once per batch element."""
    @pl.when(pl.program_id(1) == 0)
    def _():
        re = img_re_ref[0].astype(jnp.float32)
        im = img_im_ref[0].astype(jnp.float32)
        prod = re * para_re_ref[...] + im * para_nim_ref[...]    # Re(img * para)
        pooled = jnp.sum(prod, axis=0, keepdims=True) * inv_n    # (1, img_lanes)
        g = jnp.dot(pooled, wt_ref[...],
                    preferred_element_type=jnp.float32) + bias_ref[...]
        gate_ref[...] = jnp.tile(g, (1, txt_reps))               # (1, txt_lanes)
    out_ref[0] = (text_ref[0].astype(jnp.float32) * gate_ref[...]).astype(out_ref.dtype)


def _gate_kernel(img_re_ref, img_im_ref, para_re_ref, para_nim_ref,
                 wt_ref, bias_ref, gate_ref, acc_ref,
                 *, inv_n, txt_reps, tile_rows, total_rows):
    """grid = (B, image-row tiles): tiled reduction over N with a VMEM f32
    accumulator; matmul + bias only in the finalize step."""
    k = pl.program_id(1)

    @pl.when(k == 0)
    def _():
        acc_ref[...] = jnp.zeros_like(acc_ref)

    re = img_re_ref[0].astype(jnp.float32)
    im = img_im_ref[0].astype(jnp.float32)
    prod = re * para_re_ref[...] + im * para_nim_ref[...]
    if total_rows % tile_rows != 0:      # mask the ragged last tile
        row = jax.lax.broadcasted_iota(jnp.int32, prod.shape, 0) + k * tile_rows
        prod = jnp.where(row < total_rows, prod, 0.0)
    acc_ref[...] += jnp.sum(prod, axis=0, keepdims=True)

    @pl.when(k == pl.num_programs(1) - 1)
    def _():
        pooled = acc_ref[...] * inv_n
        g = jnp.dot(pooled, wt_ref[...],
                    preferred_element_type=jnp.float32) + bias_ref[...]
        gate_ref[0] = jnp.tile(g, (1, txt_reps))                 # lane-dense store


def _apply_kernel(gate_ref, text_ref, out_ref):
    out_ref[0] = (text_ref[0].astype(jnp.float32) * gate_ref[0]).astype(out_ref.dtype)


# --------------------------------------------------------------------------- #
# pallas_call wrappers
# --------------------------------------------------------------------------- #
def _compute_gate(img_re_v, img_im_v, para_re_v, para_nim_v, wt, bias,
                  *, inv_n, txt_lanes, txt_reps, gate_tile_rows):
    B, img_rows, img_lanes = img_re_v.shape
    gate_w = wt.shape[1]
    # ~0.5 MiB / streamed operand: 4 operands x 2 buffers ~= 4 MiB -> safe on
    # v5e (16 MiB scoped), v6e (32 MiB) and v7x (32 MiB scoped / 64 MiB phys).
    tn = _pick_tile_rows(img_rows, img_lanes * 4,
                         target_bytes=512 << 10, override=gate_tile_rows)
    return pl.pallas_call(
        functools.partial(_gate_kernel, inv_n=inv_n, txt_reps=txt_reps,
                          tile_rows=tn, total_rows=img_rows),
        out_shape=jax.ShapeDtypeStruct((B, 1, txt_lanes), jnp.float32),
        grid_spec=pltpu.PrefetchScalarGridSpec(
            num_scalar_prefetch=0,
            grid=(B, pl.cdiv(img_rows, tn)),
            in_specs=[
                pl.BlockSpec((1, tn, img_lanes), lambda b, k: (b, k, 0)),   # image re
                pl.BlockSpec((1, tn, img_lanes), lambda b, k: (b, k, 0)),   # image im
                pl.BlockSpec((tn, img_lanes), lambda b, k: (k, 0)),         # para re
                pl.BlockSpec((tn, img_lanes), lambda b, k: (k, 0)),         # -para im
                pl.BlockSpec((img_lanes, gate_w), lambda b, k: (0, 0)),     # W (tiled)
                pl.BlockSpec((1, gate_w), lambda b, k: (0, 0)),             # bias
            ],
            out_specs=pl.BlockSpec((1, 1, txt_lanes), lambda b, k: (b, 0, 0)),
            scratch_shapes=[pltpu.VMEM((1, img_lanes), jnp.float32)],
        ),
        compiler_params=pltpu.CompilerParams(
            dimension_semantics=("parallel", "arbitrary")),
    )(img_re_v, img_im_v, para_re_v, para_nim_v, wt, bias)


def _apply_gate(gate_v, text_v, t_rows, out_dtype):
    B, txt_rows, txt_lanes = text_v.shape
    return pl.pallas_call(
        _apply_kernel,
        out_shape=jax.ShapeDtypeStruct(text_v.shape, out_dtype),
        grid_spec=pltpu.PrefetchScalarGridSpec(
            num_scalar_prefetch=0,
            grid=(B, pl.cdiv(txt_rows, t_rows)),
            in_specs=[
                pl.BlockSpec((1, 1, txt_lanes), lambda b, r: (b, 0, 0)),       # gate
                pl.BlockSpec((1, t_rows, txt_lanes), lambda b, r: (b, r, 0)),  # text
            ],
            out_specs=pl.BlockSpec((1, t_rows, txt_lanes), lambda b, r: (b, r, 0)),
        ),
        compiler_params=pltpu.CompilerParams(
            dimension_semantics=("parallel", "parallel")),
    )(gate_v, text_v)


def text_frequency_selection(text, image_re, image_im, select_para, conv_w, conv_b,
                             *, force_two_pass=False, gate_tile_rows=None,
                             apply_tile_rows=None):
    """text: (B, S, C); image_re/im: (B, N, C); select_para: (N, C, 2);
    conv_w: (C, C, 1); conv_b: (C,)."""
    B, S, C = text.shape
    _, N, _ = image_re.shape

    text_v, txt_rows, txt_lanes, txt_reps, gate_w, c_pad, s_pad = _plan_text_layout(text)
    (img_re_v, img_im_v, para_re_v, para_nim_v,
     img_rows, img_lanes, img_reps) = _plan_image_layout(image_re, image_im, select_para)
    wt, bias = _prep_weights(conv_w, conv_b, C, gate_w, img_reps)
    assert wt.shape == (img_lanes, gate_w) and gate_w * txt_reps == txt_lanes
    inv_n = 1.0 / N

    txt_item = jnp.dtype(text.dtype).itemsize
    img_item = jnp.dtype(image_re.dtype).itemsize

    # ~2 MiB text tiles: double-buffered in+out = 8 MiB, inside every
    # generation's scoped-VMEM default.
    t_rows = _pick_tile_rows(txt_rows, txt_lanes * txt_item,
                             target_bytes=2 << 20, override=apply_tile_rows,
                             ensure_two_tiles=(B == 1))

    # Fused single-kernel path when the per-batch gate operands (kept resident
    # across text tiles) + double-buffered text tiles fit comfortably under the
    # tightest scoped-VMEM default (8 MiB budget leaves headroom on v5e/v7x).
    gate_resident = 2 * img_rows * img_lanes * (2 * img_item + 2 * 4)
    text_stream = 2 * 2 * t_rows * txt_lanes * txt_item
    consts = (img_lanes * gate_w + gate_w + txt_lanes + img_lanes) * 4
    use_fused = (not force_two_pass) and \
        (gate_resident + text_stream + consts) <= (8 << 20)

    if use_fused:
        out_v = pl.pallas_call(
            functools.partial(_fused_kernel, inv_n=inv_n, txt_reps=txt_reps),
            out_shape=jax.ShapeDtypeStruct(text_v.shape, text.dtype),
            grid_spec=pltpu.PrefetchScalarGridSpec(
                num_scalar_prefetch=0,
                grid=(B, pl.cdiv(txt_rows, t_rows)),
                in_specs=[
                    pl.BlockSpec((1, img_rows, img_lanes), lambda b, s: (b, 0, 0)),
                    pl.BlockSpec((1, img_rows, img_lanes), lambda b, s: (b, 0, 0)),
                    pl.BlockSpec((img_rows, img_lanes), lambda b, s: (0, 0)),
                    pl.BlockSpec((img_rows, img_lanes), lambda b, s: (0, 0)),
                    pl.BlockSpec((img_lanes, gate_w), lambda b, s: (0, 0)),
                    pl.BlockSpec((1, gate_w), lambda b, s: (0, 0)),
                    pl.BlockSpec((1, t_rows, txt_lanes), lambda b, s: (b, s, 0)),
                ],
                out_specs=pl.BlockSpec((1, t_rows, txt_lanes), lambda b, s: (b, s, 0)),
                scratch_shapes=[pltpu.VMEM((1, txt_lanes), jnp.float32)],
            ),
            compiler_params=pltpu.CompilerParams(
                dimension_semantics=("parallel", "arbitrary")),
        )(img_re_v, img_im_v, para_re_v, para_nim_v, wt, bias, text_v)
    else:
        gate_v = _compute_gate(img_re_v, img_im_v, para_re_v, para_nim_v, wt, bias,
                               inv_n=inv_n, txt_lanes=txt_lanes, txt_reps=txt_reps,
                               gate_tile_rows=gate_tile_rows)
        out_v = _apply_gate(gate_v, text_v, t_rows, text.dtype)

    # Undo the wrapper-side layout plumbing.
    if txt_reps > 1:
        out = out_v.reshape(B, S + s_pad, C)
        return out[:, :S, :] if s_pad else out
    if c_pad:
        return out_v[:, :, :C]
    return out_v


# --------------------------------------------------------------------------- #
# Pure-JAX reference (mirrors the PyTorch module).
# --------------------------------------------------------------------------- #
def _reference(text, image_re, image_im, select_para, conv_w, conv_b):
    para_re = select_para[..., 0]
    para_im = select_para[..., 1]
    gated_real = image_re * para_re[None] - image_im * para_im[None]   # (B, N, C)
    pooled = jnp.mean(gated_real, axis=1)                              # (B, C)
    gate = pooled @ conv_w[:, :, 0].T + conv_b                         # (B, C)
    return text * gate[:, None, :]


if __name__ == "__main__":
    def make_inputs(B, N, S, C, key):
        ks = jax.random.split(key, 6)
        text = jax.random.normal(ks[0], (B, S, C), dtype=jnp.float32)
        image_re = jax.random.normal(ks[1], (B, N, C), dtype=jnp.float32)
        image_im = jax.random.normal(ks[2], (B, N, C), dtype=jnp.float32)
        select_para = jax.random.normal(ks[3], (N, C, 2), dtype=jnp.float32)
        conv_w = jax.random.normal(ks[4], (C, C, 1), dtype=jnp.float32) * 0.1
        conv_b = jax.random.normal(ks[5], (C,), dtype=jnp.float32) * 0.1
        return text, image_re, image_im, select_para, conv_w, conv_b

    # 1) module's small shapes -> fused single-kernel path (lane-dense).
    args = make_inputs(2, 8, 8, 32, jax.random.PRNGKey(0))
    ref = _reference(*args)
    out = jax.block_until_ready(text_frequency_selection(*args))
    assert out.shape == ref.shape
    assert jnp.allclose(out, ref, atol=1e-4, rtol=1e-4), "fused path mismatch"

    # 2) same shapes, forced two-pass (tiled-reduction gate kernel + apply kernel).
    out2 = jax.block_until_ready(text_frequency_selection(*args, force_two_pass=True))
    assert jnp.allclose(out2, ref, atol=1e-4, rtol=1e-4), "two-pass mismatch"

    # 3) multi-tile reduction (ragged, masked last tile) + multi-tile apply,
    #    exercised on both strategies.
    args3 = make_inputs(2, 40, 64, 32, jax.random.PRNGKey(1))
    ref3 = _reference(*args3)
    out3 = jax.block_until_ready(
        text_frequency_selection(*args3, force_two_pass=True,
                                 gate_tile_rows=8, apply_tile_rows=8))
    assert jnp.allclose(out3, ref3, atol=1e-4, rtol=1e-4), "tiled gate mismatch"
    out3f = jax.block_until_ready(
        text_frequency_selection(*args3, apply_tile_rows=8))
    assert jnp.allclose(out3f, ref3, atol=1e-4, rtol=1e-4), "tiled fused mismatch"

    print("KERNEL_OK")
</pallas_src>

<mosaic_0001>
module attributes {stable_mosaic.version = 11 : i64} {
  func.func @_fused_kernel(%arg0: i32, %arg1: i32, %arg2: memref<1x2x128xf32, #tpu.memory_space<vmem>>, %arg3: memref<1x2x128xf32, #tpu.memory_space<vmem>>, %arg4: memref<2x128xf32, #tpu.memory_space<vmem>>, %arg5: memref<2x128xf32, #tpu.memory_space<vmem>>, %arg6: memref<128x32xf32, #tpu.memory_space<vmem>>, %arg7: memref<1x32xf32, #tpu.memory_space<vmem>>, %arg8: memref<1x2x128xf32, #tpu.memory_space<vmem>>, %arg9: memref<1x2x128xf32, #tpu.memory_space<vmem>>, %arg10: memref<1x128xf32, #tpu.memory_space<vmem>>) attributes {dimension_semantics = [#tpu.dimension_semantics<parallel>, #tpu.dimension_semantics<arbitrary>], iteration_bounds = array<i64: 2, 1>, scalar_prefetch = 0 : i64, scratch_operands = 1 : i64, tpu.core_type = #tpu.core_type<tc>, window_params = [{transform_indices = @transform_0, window_bounds = array<i64: 1, 2, 128>}, {transform_indices = @transform_1, window_bounds = array<i64: 1, 2, 128>}, {pipeline_mode = #tpu.pipeline_mode<synchronous>, transform_indices = @transform_2, window_bounds = array<i64: 2, 128>}, {pipeline_mode = #tpu.pipeline_mode<synchronous>, transform_indices = @transform_3, window_bounds = array<i64: 2, 128>}, {pipeline_mode = #tpu.pipeline_mode<synchronous>, transform_indices = @transform_4, window_bounds = array<i64: 128, 32>}, {pipeline_mode = #tpu.pipeline_mode<synchronous>, transform_indices = @transform_5, window_bounds = array<i64: 1, 32>}, {transform_indices = @transform_6, window_bounds = array<i64: 1, 2, 128>}, {transform_indices = @transform_7, window_bounds = array<i64: 1, 2, 128>}]} {
    %c0_i32 = arith.constant 0 : i32
    %0 = arith.cmpi eq, %arg1, %c0_i32 : i32
    %1 = arith.extui %0 : i1 to i32
    %c0_i32_0 = arith.constant 0 : i32
    %2 = arith.cmpi ne, %1, %c0_i32_0 : i32
    scf.if %2 {
      %c0_8 = arith.constant 0 : index
      %c0_9 = arith.constant 0 : index
      %c0_10 = arith.constant 0 : index
      %11 = vector.load %arg2[%c0_8, %c0_9, %c0_10] : memref<1x2x128xf32, #tpu.memory_space<vmem>>, vector<1x2x128xf32>
      %12 = vector.shape_cast %11 : vector<1x2x128xf32> to vector<2x128xf32>
      %c0_11 = arith.constant 0 : index
      %c0_12 = arith.constant 0 : index
      %c0_13 = arith.constant 0 : index
      %13 = vector.load %arg3[%c0_11, %c0_12, %c0_13] : memref<1x2x128xf32, #tpu.memory_space<vmem>>, vector<1x2x128xf32>
      %14 = vector.shape_cast %13 : vector<1x2x128xf32> to vector<2x128xf32>
      %c0_14 = arith.constant 0 : index
      %c0_15 = arith.constant 0 : index
      %15 = vector.load %arg4[%c0_14, %c0_15] : memref<2x128xf32, #tpu.memory_space<vmem>>, vector<2x128xf32>
      %16 = arith.mulf %12, %15 : vector<2x128xf32>
      %c0_16 = arith.constant 0 : index
      %c0_17 = arith.constant 0 : index
      %17 = vector.load %arg5[%c0_16, %c0_17] : memref<2x128xf32, #tpu.memory_space<vmem>>, vector<2x128xf32>
      %18 = arith.mulf %14, %17 : vector<2x128xf32>
      %19 = arith.addf %16, %18 : vector<2x128xf32>
      %cst = arith.constant dense<0.000000e+00> : vector<128xf32>
      %20 = vector.multi_reduction <add>, %19, %cst [0] : vector<2x128xf32> to vector<128xf32>
      %21 = vector.shape_cast %20 : vector<128xf32> to vector<1x128xf32>
      %cst_18 = arith.constant 1.250000e-01 : f32
      %22 = vector.broadcast %cst_18 : f32 to vector<1x128xf32>
      %23 = arith.mulf %21, %22 : vector<1x128xf32>
      %c0_19 = arith.constant 0 : index
      %c0_20 = arith.constant 0 : index
      %24 = vector.load %arg6[%c0_19, %c0_20] : memref<128x32xf32, #tpu.memory_space<vmem>>, vector<128x32xf32>
      %cst_21 = arith.constant dense<0.000000e+00> : vector<1x32xf32>
      %25 = tpu.matmul %23, %24, %cst_21 {dimension_numbers = #tpu.dot_dimension_numbers<[1], [0], [0], [1], [0, 0, 1, 1], [], []>} : vector<1x128xf32>, vector<128x32xf32>, vector<1x32xf32> -> vector<1x32xf32>
      %c0_22 = arith.constant 0 : index
      %c0_23 = arith.constant 0 : index
      %26 = vector.load %arg7[%c0_22, %c0_23] : memref<1x32xf32, #tpu.memory_space<vmem>>, vector<1x32xf32>
      %27 = arith.addf %25, %26 : vector<1x32xf32>
      %28 = tpu.concatenate %27, %27, %27, %27 in 1 : vector<1x32xf32>, vector<1x32xf32>, vector<1x32xf32>, vector<1x32xf32> -> vector<1x128xf32>
      %c0_24 = arith.constant 0 : index
      %c0_25 = arith.constant 0 : index
      %29 = vector.load %arg10[%c0_24, %c0_25] : memref<1x128xf32, #tpu.memory_space<vmem>>, vector<1x128xf32>
      tpu.vector_store %arg10[%c0_24, %c0_25], %28 {strides = array<i32>} : memref<1x128xf32, #tpu.memory_space<vmem>>, vector<1x128xf32>,
    } else {
    }
    %c0 = arith.constant 0 : index
    %c0_1 = arith.constant 0 : index
    %c0_2 = arith.constant 0 : index
    %3 = vector.load %arg8[%c0, %c0_1, %c0_2] : memref<1x2x128xf32, #tpu.memory_space<vmem>>, vector<1x2x128xf32>
    %4 = vector.shape_cast %3 : vector<1x2x128xf32> to vector<2x128xf32>
    %c0_3 = arith.constant 0 : index
    %c0_4 = arith.constant 0 : index
    %5 = vector.load %arg10[%c0_3, %c0_4] : memref<1x128xf32, #tpu.memory_space<vmem>>, vector<1x128xf32>
    %6 = vector.broadcast %5 : vector<1x128xf32> to vector<2x128xf32>
    %7 = arith.mulf %4, %6 : vector<2x128xf32>
    %c0_5 = arith.constant 0 : index
    %c0_6 = arith.constant 0 : index
    %c0_7 = arith.constant 0 : index
    %8 = vector.load %arg9[%c0_5, %c0_6, %c0_7] : memref<1x2x128xf32, #tpu.memory_space<vmem>>, vector<1x2x128xf32>
    %9 = vector.shape_cast %8 : vector<1x2x128xf32> to vector<2x128xf32>
    %10 = vector.shape_cast %7 : vector<2x128xf32> to vector<1x2x128xf32>
    tpu.vector_store %arg9[%c0_5, %c0_6, %c0_7], %10 {strides = array<i32>} : memref<1x2x128xf32, #tpu.memory_space<vmem>>, vector<1x2x128xf32>,
    return
  }
  func.func @transform_0(%arg0: i32, %arg1: i32) -> (i32, i32, i32) {
    %c0_i32 = arith.constant 0 : i32
    %c0_i32_0 = arith.constant 0 : i32
    %c0_i32_1 = arith.constant 0 : i32
    return %arg0, %c0_i32, %c0_i32_0 : i32, i32, i32
  }
  func.func @transform_1(%arg0: i32, %arg1: i32) -> (i32, i32, i32) {
    %c0_i32 = arith.constant 0 : i32
    %c0_i32_0 = arith.constant 0 : i32
    %c0_i32_1 = arith.constant 0 : i32
    return %arg0, %c0_i32, %c0_i32_0 : i32, i32, i32
  }
  func.func @transform_2(%arg0: i32, %arg1: i32) -> (i32, i32) {
    %c0_i32 = arith.constant 0 : i32
    %c0_i32_0 = arith.constant 0 : i32
    %c0_i32_1 = arith.constant 0 : i32
    return %c0_i32, %c0_i32_0 : i32, i32
  }
  func.func @transform_3(%arg0: i32, %arg1: i32) -> (i32, i32) {
    %c0_i32 = arith.constant 0 : i32
    %c0_i32_0 = arith.constant 0 : i32
    %c0_i32_1 = arith.constant 0 : i32
    return %c0_i32, %c0_i32_0 : i32, i32
  }
  func.func @transform_4(%arg0: i32, %arg1: i32) -> (i32, i32) {
    %c0_i32 = arith.constant 0 : i32
    %c0_i32_0 = arith.constant 0 : i32
    %c0_i32_1 = arith.constant 0 : i32
    return %c0_i32, %c0_i32_0 : i32, i32
  }
  func.func @transform_5(%arg0: i32, %arg1: i32) -> (i32, i32) {
    %c0_i32 = arith.constant 0 : i32
    %c0_i32_0 = arith.constant 0 : i32
    %c0_i32_1 = arith.constant 0 : i32
    return %c0_i32, %c0_i32_0 : i32, i32
  }
  func.func @transform_6(%arg0: i32, %arg1: i32) -> (i32, i32, i32) {
    %c0_i32 = arith.constant 0 : i32
    %c0_i32_0 = arith.constant 0 : i32
    return %arg0, %arg1, %c0_i32 : i32, i32, i32
  }
  func.func @transform_7(%arg0: i32, %arg1: i32) -> (i32, i32, i32) {
    %c0_i32 = arith.constant 0 : i32
    %c0_i32_0 = arith.constant 0 : i32
    return %arg0, %arg1, %c0_i32 : i32, i32, i32
  }
}

</mosaic_0001>

<bundles_post_ra>
// kernel: tpu_custom_call.1
= control target key start
LH: loop header
LB: loop body
LE: loop exit
PB: predicated region body
PF: predicated region fallthrough
CT: control target
= control target key end

     0   :  { %s886_s0 = inlined_call_operand.vmem [shape: f32[2,2,128], index: 0, kind: input, shape index: {}]   ;;  %s887_s1 = inlined_call_operand.vmem [shape: f32[2,2,128], index: 1, kind: input, shape index: {}]   ;;  %s888_s2 = inlined_call_operand.vmem [shape: f32[2,128], index: 2, kind: input, shape index: {}]   ;;  %s889_s3 = inlined_call_operand.vmem [shape: f32[2,128], index: 3, kind: input, shape index: {}]   ;;  %s890_s4 = inlined_call_operand.vmem [shape: f32[128,32], index: 4, kind: input, shape index: {}]   ;;  %s891_s5 = inlined_call_operand.vmem [shape: f32[1,32], index: 5, kind: input, shape index: {}]   ;;  %s892_s6 = inlined_call_operand.vmem [shape: f32[2,2,128], index: 6, kind: input, shape index: {}]   ;;  %s893_s7 = inlined_call_operand.hbm [shape: f32[2,2,128], index: 7, kind: output, shape index: {}]  }
   0x1   :  { %894 = sst [smem:[#allocation6_spill]] %s886_s0 }
   0x2   :  { %895 = sst [smem:[#allocation7_spill]] %s887_s1 }
   0x3   :  { %12 = vsyncpa [#allocation4], 0 }
   0x4   :  { %14 = vsyncpa [#allocation4 + $0x1], 0  ;;  %s721_s24 = smov 0   ;;  %s723_s25 = smov 0  }
   0x5   :  { %s725_s26 = smov 0   ;;  %s727_s27 = smov 0  }
   0x6   :  { %s729_s28 = smov 0   ;;  %s731_s29 = smov 0  }
   0x7 LB: > { %s526_s30 = sadd.s32 4294967295, %s676_s29   ;;  %s527_s8 = sadd.s32 4294967294, %s676_s29   ;;  %s676_s29 = sphi %s731_s29, %s20_s29   ;;  %s672_s28 = sphi %s729_s28, %s904_s28   ;;  %s668_s27 = sphi %s727_s27, %s903_s27   ;;  %s664_s26 = sphi %s725_s26, %s902_s26   ;;  %s660_s25 = sphi %s723_s25, %s901_s25   ;;  %s656_s24 = sphi %s721_s24, %s900_s24  }
   0x8   : > { %s32_s9 = sadd.s32 1, %s672_s28  ;;  %s205_s10 = sadd.s32 1, %s664_s26 }
   0x9   : > { %p34_p0 = scmp.ge.s32.totalorder %s32_s9, 2  ;;  %p215_p1 = scmp.ne.s32.totalorder %s664_s26, %s660_s25 }
   0xa   : > { %p216_p2 = scmp.eq.s32.totalorder %s526_s30, 1  ;;  %p221_p3 = scmp.ne.s32.totalorder %s660_s25, %s656_s24 }
   0xb   : > { %s906_s9 = smov (%p34_p0, %s32_s9), 0  ;;  %p222_p5 = scmp.eq.s32.totalorder %s527_s8, 1 }
   0xc   : > { %p761_p4 = por %p216_p2, %p215_p1  ;;  %s200_s12 = ssub.s32 %s672_s28, %s906_s9 }
   0xd   : > { %p530_p6 = scmp.ge.s32.totalorder %s676_s29, 1  ;;  %p203_p7 = scmp.eq.s32.totalorder %s200_s12, 0 }
   0xe   : > { %p768_p8 = por %p222_p5, %p221_p3  ;;  %p276_p9 = scmp.lt.s32.totalorder %s676_s29, 3 }
   0xf   : > { %s774_s14 = scalar_select %p203_p7, %s664_s26, %s205_s10  }
  0x10   : > { %p277_p10 = pnand %p530_p6, %p276_p9 }
  0x11   : > { %p318_p11 = scmp.lt.s32.totalorder (!%p277_p10), %s668_s27, 1  ;;  %s898_s0 = sld [smem:[#allocation6_spill]] (!%p277_p10) }
  0x12   : > { %280 = sbr.rel (%p277_p10) target bundleno = 321 (0x141), region = 48  ;;  %s899_s1 = sld [smem:[#allocation7_spill]] (!%p277_p10) }
  0x13   : > { %s678_s8 = smov (!%p277_p10), 96   ;;  %s679_s10 = smov (!%p277_p10), 32  }
  0x14   : > { %s680_s15 = smov (!%p277_p10), 64   ;;  %s315_s16 = sand.u32 (!%p277_p10), 1, %s660_s25  }
  0x15   : > { %s531_s18 = sshll.u32 (!%p277_p10), %s315_s16, 1  ;;  %s536_s19 = sshll.u32 (!%p277_p10), %s668_s27, 1 }
  0x16   : > { %s426_s23 = scalar_lea.hbm (!%p277_p10), %s893_s7, %s536_s19  ;;  %s618_s19 = scalar_lea.hbm (!%p277_p10), %s893_s7, 4 }
  0x17   : > { %v368_v0 = vld [vmem:[%s890_s4 + $0x78] sm:$0xff]  ;;  %v367_v1 = vld [vmem:[%s890_s4 + $0x70] sm:$0xff]  ;;  %v366_v2 = vld [vmem:[%s890_s4 + $0x68] sm:$0xff]  ;;  %s319_s21 = scalar_select %p318_p11, %s668_s27, 1  ;;  %vm344_vm0 = vcmask 1041408   ;;  %vm400_vm1 = vcmask 261120  }
  0x18   : > { %370 = vmatpush.msra.mxu0 %v368_v0  ;;  %v365_v3 = vld [vmem:[%s890_s4 + $0x60] sm:$0xff]  ;;  %v364_v6 = vld [vmem:[%s890_s4 + $0x58] sm:$0xff]  ;;  %v363_v11 = vld [vmem:[%s890_s4 + $0x50] sm:$0xff]  ;;  %vm402_vm2 = vcmask 523264   ;;  %vm404_vm3 = vcmask 785408  }
  0x19   : > { %s790_s30 = sshll.u32 %s319_s21, 1  ;;  %v339_v4 = vld [vmem:[%s888_s2] sm:$0x3]  ;;  %v362_v13 = vld [vmem:[%s890_s4 + $0x48] sm:$0xff]  ;;  %v360_v17 = vld [vmem:[%s890_s4 + $0x38] sm:$0xff] }
  0x1a   : > { %371 = vmatpush.msra.mxu0 %v367_v1  ;;  %s321_s12 = scalar_lea.vmem %s898_s0, %s790_s30  ;;  %s325_s17 = scalar_lea.vmem %s899_s1, %s790_s30  ;;  %v341_v5 = vld [vmem:[%s889_s3] sm:$0x3]  ;;  %v359_v19 = vld [vmem:[%s890_s4 + $0x30] sm:$0xff]  ;;  %v358_v21 = vld [vmem:[%s890_s4 + $0x28] sm:$0xff] }
  0x1b   : > { %v337_v7 = vld [vmem:[%s321_s12] sm:$0x3]  ;;  %v356_v25 = vld [vmem:[%s890_s4 + $0x18] sm:$0xff]  ;;  %v355_v26 = vld [vmem:[%s890_s4 + $0x10] sm:$0xff]  ;;  %s332_s20 = scalar_lea.vmem %s892_s6, %s790_s30  ;;  %s415_s0 = scalar_lea.sflag [#allocation4], %s315_s16 }
  0x1c   : > { %372 = vmatpush.msra.mxu0 %v366_v2  ;;  %v338_v8 = vld [vmem:[%s325_s17] sm:$0x3]  ;;  %v340_v9 = vmul.f32 %v339_v4, %v337_v7  ;;  %v354_v28 = vld [vmem:[%s890_s4 + $0x8] sm:$0xff] }
  0x1d   : > { %v342_v10 = vmul.f32 %v341_v5, %v338_v8  ;;  %v361_v15 = vld [vmem:[%s890_s4 + $0x40] sm:$0xff] }
  0x1e   : > { %373 = vmatpush.msra.mxu0 %v365_v3  ;;  %v357_v23 = vld [vmem:[%s890_s4 + $0x20] sm:$0xff] }
  0x1f   : > { %v343_v12 = vadd.f32 %v342_v10, %v340_v9  ;;  %v353_v29 = vld [vmem:[%s890_s4] sm:$0xff] }
  0x20   : > { %374 = vmatpush.msra.mxu0 %v364_v6  ;;  %v369_v31 = vld [vmem:[%s891_s5] sm:$0x1] }
  0x21   : > { %v345_v14 = vsel %vm344_vm0, %v343_v12, 0.0  ;;  %v407_v40 = vld [vmem:[%s332_s20] sm:$0x3] }
  0x22   : > { %375 = vmatpush.msra.mxu0 %v363_v11  ;;  %v346_v16 = vrot.slane %v345_v14, 4 }
  0x24   : > { %376 = vmatpush.msra.mxu0 %v362_v13  ;;  %v347_v18 = vadd.f32 %v346_v16, %v345_v14 }
  0x26   : > { %377 = vmatpush.msra.mxu0 %v361_v15  ;;  %v348_v20 = vrot.slane %v347_v18, 2 }
  0x28   : > { %378 = vmatpush.msra.mxu0 %v360_v17  ;;  %v349_v22 = vadd.f32 %v348_v20, %v347_v18 }
  0x2a   : > { %379 = vmatpush.msra.mxu0 %v359_v19  ;;  %v350_v24 = vrot.slane %v349_v22, 1 }
  0x2c   : > { %380 = vmatpush.msra.mxu0 %v358_v21  ;;  %v351_v27 = vadd.f32 %v350_v24, %v349_v22 }
  0x2e   : > { %381 = vmatpush.msra.mxu0 %v357_v23  ;;  %v352_v30 = vmul.f32 0.125, %v351_v27 }
  0x30   : > { %382 = vmatpush.msra.mxu0 %v356_v25 }
  0x32   : > { %383 = vmatpush.msra.mxu0 %v355_v26 }
  0x34   : > { %384 = vmatpush.msra.mxu0 %v354_v28 }
  0x36   : > { %385 = vmatpush.msra.mxu0 %v353_v29 }
  0x37   : > { %386 = vmatmul.f32.vlgmr.msra.gmra.mxu0 %v352_v30 }
  0xb4   : > { %v387_v32 = vpop.f32.mrf.mxu0 }
  0xb5   : > { %v388_v33 = vadd.f32 %v387_v32, %v369_v31 }
  0xb7   : > { %397 = vrot.lane.b32.xlu1 %v388_v33, %s678_s8  ;;  %391 = vrot.lane.b32.xlu0 %v388_v33, %s679_s10  ;;  %s317_s8 = scalar_lea.vmem [#allocation3], %s531_s18 }
  0xb8   : > { %s428_s10 = sshll.u32 %s317_s8, 4  ;;  %s429_s10 = int_to_ptr.vmem [resolvable:$true] %s428_s10 }
  0xbf   : > { %394 = vrot.lane.b32.xlu0 %v388_v33, %s680_s15  ;;  %s430_s15 = sshll.u32 %s426_s23, 4  ;;  %s431_s15 = int_to_ptr.hbm [resolvable:$true] %s430_s15 }
  0xc0   : > { %s612_s27 = sshra.s32 %s431_s15, 4  ;;  %s613_s27 = int_to_ptr.hbm [resolvable:$true] %s612_s27 }
  0xc1   : > { %s614_s1 = scalar_lea.hbm %s613_s27, 2  ;;  %p619_p1 = scmp.lt.s32.totalorder %s613_s27, %s893_s7 }
  0xc2   : > { %p615_p12 = scmp.ne.s32.totalorder %s613_s27, %s614_s1  ;;  %p620_p2 = scmp.lt.s32.totalorder %s618_s19, %s614_s1 }
  0xc4   : > { %p616_p13 = pnand %p615_p12, %p761_p4  ;;  %p621_p3 = por %p620_p2, %p619_p1 }
  0xc6   : > { %p617_p0 = pneg %p616_p13 }
  0xc8   : > { %p622_p5 = pnand %p621_p3, %p617_p0 }
 0x129   : > { %v392_v34 = vpop.permute.xlu0 %391  ;;  %v398_v37 = vpop.permute.xlu1 %397 }
 0x12a   : > { %v401_v35 = vsel %vm400_vm1, %v388_v33, %v392_v34 }
 0x131   : > { %v395_v36 = vpop.permute.xlu0 %394 }
 0x132   : > { %v403_v38 = vsel %vm402_vm2, %v401_v35, %v395_v36 }
 0x133   : > { %v405_v39 = vsel %vm404_vm3, %v403_v38, %v398_v37 }
 0x134   : > { %406 = vst [vmem:[#allocation2] sm:$0x1] %v405_v39 }
 0x13b   : > { %v597_v41 = vld [vmem:[#allocation2] ss:$0 sm:$0xff] }
 0x13c   : > { %v412_v42 = vmul.f32 %v597_v41, %v407_v40 }
 0x13e   : > { %413 = vst [vmem:[%s317_s8] sm:$0x3] %v412_v42 }
 0x13f   : > { %625 = shalt.err (!%p622_p5)
}
 0x140   : > { %539 = dma.vmem_to_hbm [thread:$0]  (%p761_p4), %s429_s10, 32, %s431_s15, %s415_s0  }
 0x141 PF: > { %p545_p6 = scmp.ge.s32.totalorder %s676_s29, 2  ;;  %s442_s16 = sand.u32 1, %s656_s24  }
 0x142   : > { %s443_s20 = scalar_lea.sflag [#allocation4], %s442_s16 }
 0x143   : > { %p542_p7 = pnand %p545_p6, %p768_p8 }
 0x145   : > { %p543_p9 = pneg %p542_p7 }
 0x147   : > { %651 = dma.done.wait (%p543_p9), %s443_s20, 32  }
 0x148   : > { %653 = vsyncadd (%p543_p9), %s443_s20, 4294967264  ;;  %s20_s29 = sadd.s32 1, %s676_s29   ;;  %s900_s24 = smov %s660_s25 }
 0x149   : > { %p17_p10 = scmp.ge.s32.totalorder %s20_s29, 4   ;;  %s901_s25 = smov %s664_s26 }
 0x14a   : > { %s902_s26 = smov %s774_s14  ;;  %s903_s27 = smov %s672_s28 }
 0x14b   : > { %s904_s28 = smov %s906_s9  ;;  %19 = sbr.rel (!%p17_p10) target bundleno = 7 (0x7), region = 93 }
 0x150   :  { %449 = vsyncpa [#allocation4], 1 }
 0x151   :  { %451 = vsyncpa [#allocation4 + $0x1], 1 }

</bundles_post_ra>
